<compile_context>
chip_gen: v6e
topology: v6e:2x2x1
jax: 0.10.0
libtpu: 0.0.40
codegen_flags: <defaults>
</compile_context>

<pallas_src>
import functools

import jax
import jax.numpy as jnp
from jax import lax
from jax.experimental import pallas as pl
from jax.experimental.pallas import tpu as pltpu


def _ice_loss_kernel(t_ref, x_ref, out_ref, acc_ref, *,
                     smoothing, base, n_rows, tn, tiles_per_shard):
    """Processes one (tn, C) tile of logits + (tn, 1) targets.

    Accumulates masked per-row losses into a VMEM (tn, 1) accumulator and, on
    the last tile of this shard, writes the shard partial sum into out_ref.
    """
    g = pl.program_id(0)          # shard (parallel axis, megacore-split)
    i = pl.program_id(1)          # tile within shard (reduction axis)

    @pl.when(i == 0)
    def _():
        acc_ref[...] = jnp.zeros_like(acc_ref)

    x = x_ref[...].astype(jnp.float32)            # (tn, C)
    t = t_ref[...]                                # (tn, 1) int32
    tn_, c = x.shape
    # NOTE: C is never tiled; if it ever is, `c`, lse and the argmax below
    # would become tile-local and wrong.

    col = lax.broadcasted_iota(jnp.int32, (tn_, c), 1)

    # argmax(dim=1) with first-occurrence tie-break (matches torch / jnp).
    row_max = jnp.max(x, axis=-1, keepdims=True)                       # (tn, 1)
    argmax_idx = jnp.min(jnp.where(x == row_max, col, c),
                         axis=-1, keepdims=True)                       # (tn, 1)
    incorrect = argmax_idx != t                                        # (tn, 1)

    # log_softmax pieces with folded smoothing weights — no (tn, C) weights.
    z = x - row_max                                                    # (tn, C)
    lse = jnp.log(jnp.sum(jnp.exp(z), axis=-1, keepdims=True))         # (tn, 1)
    z_t = jnp.sum(jnp.where(col == t, z, 0.0), axis=-1, keepdims=True) # (tn, 1)

    coef = (1.0 - smoothing) - base
    # loss_i = -sum_c w_c * log_prob_ic
    #        = -(base * (sum_c z - C*lse) + coef * (z_target - lse))
    loss = -coef * (z_t - lse)                                         # (tn, 1)
    if base != 0.0:   # trace-time specialization: skip the smoothing term if s==0
        sum_z = jnp.sum(z, axis=-1, keepdims=True)                     # (tn, 1)
        loss = loss - base * (sum_z - c * lse)

    # Row-validity mask: supports N not divisible by the tile.  Ragged-tail
    # rows and clamped duplicate tiles contribute exactly zero even if their
    # padded logits hold garbage/NaN, because jnp.where discards that branch
    # before it ever reaches the accumulator.
    tile_idx = g * tiles_per_shard + i
    row = tile_idx * tn + lax.broadcasted_iota(jnp.int32, (tn_, 1), 0)
    gate = incorrect & (row < n_rows)

    acc_ref[...] += jnp.where(gate, loss, 0.0)

    @pl.when(i == pl.num_programs(1) - 1)
    def _():
        total = jnp.sum(acc_ref[...])
        # Lane-dense (one full vreg) write of the shard partial; the wrapper
        # reads element [g, 0, 0].
        out_ref[...] = jnp.full(out_ref.shape, total, jnp.float32)


def _pick_row_tile(n, c, itemsize, num_shards):
    """Largest row tile whose double-buffered logits fit a VMEM budget that is
    safe on every TPU generation (v5e 16 MiB scoped default, v7x 64 MiB
    physical).  We budget 16 MiB for the logits pipeline and explicitly set
    vmem_limit_bytes=32 MiB, leaving headroom for targets / accumulator."""
    budget = 16 * 1024 * 1024
    tn = budget // max(1, 2 * c * itemsize)
    tn = max(16, min(int(tn), 1024))
    tn -= tn % 16                                     # sublane multiple (bf16 too)
    rows_per_shard = -(-n // num_shards)
    tn = min(tn, max(16, ((rows_per_shard + 15) // 16) * 16))
    return tn


def incorrect_cross_entropy_loss(logits, target, smoothing=0.0, *, num_shards=2):
    """logits: (N, C) float (f32 or bf16); target: (N,) int.  Returns scalar f32."""
    n, c = logits.shape
    assert n >= 1 and c >= 1
    itemsize = jnp.dtype(logits.dtype).itemsize
    tn = _pick_row_tile(n, c, itemsize, num_shards)

    total_tiles = pl.cdiv(n, tn)
    g_shards = max(1, min(num_shards, total_tiles))
    tiles_per_shard = pl.cdiv(total_tiles, g_shards)

    base = 0.0 if c <= 1 else float(smoothing) / (c - 1.0)
    t2 = target.astype(jnp.int32).reshape(n, 1)

    def tile_map(g, i):
        j = g * tiles_per_shard + i
        return (jnp.minimum(j, total_tiles - 1), 0)   # clamp; dup tiles are masked

    kernel = functools.partial(
        _ice_loss_kernel,
        smoothing=float(smoothing), base=base, n_rows=n,
        tn=tn, tiles_per_shard=tiles_per_shard)

    cost = pl.CostEstimate(
        flops=int(8 * n * c),
        transcendentals=int(n * c + n),
        bytes_accessed=int(n * c * itemsize + n * 4 + g_shards * 8 * 128 * 4))

    partials = pl.pallas_call(
        kernel,
        out_shape=jax.ShapeDtypeStruct((g_shards, 8, 128), jnp.float32),
        grid_spec=pltpu.PrefetchScalarGridSpec(
            num_scalar_prefetch=0,
            grid=(g_shards, tiles_per_shard),
            in_specs=[
                pl.BlockSpec((tn, 1), tile_map),      # targets
                pl.BlockSpec((tn, c), tile_map),      # logits (C untiled on lanes)
            ],
            out_specs=pl.BlockSpec((1, 8, 128), lambda g, i: (g, 0, 0)),
            scratch_shapes=[pltpu.VMEM((tn, 1), jnp.float32)],
        ),
        compiler_params=pltpu.CompilerParams(
            dimension_semantics=("parallel", "arbitrary"),
            vmem_limit_bytes=32 * 1024 * 1024),
        cost_estimate=cost,
    )(t2, logits)

    return jnp.sum(partials[:, 0, 0]) / n


def _reference(logits, target, smoothing):
    """Plain-JAX reference mirroring the PyTorch module."""
    n, c = logits.shape
    x = logits.astype(jnp.float32)
    correct = (jnp.argmax(x, axis=1) == target).astype(jnp.float32)
    log_prob = jax.nn.log_softmax(x, axis=-1)
    base = 0.0 if c <= 1 else smoothing / (c - 1.0)
    onehot = jax.nn.one_hot(target, c, dtype=jnp.float32)
    weight = base * (1.0 - onehot) + (1.0 - smoothing) * onehot
    loss_per_sample = jnp.sum(-weight * log_prob, axis=-1)
    return jnp.mean(loss_per_sample * (1.0 - correct))


if __name__ == "__main__":
    key = jax.random.PRNGKey(0)
    smoothing = 0.1

    # Case 1: f32, divisible batch.
    N, C = 64, 32
    k1, k2, key = jax.random.split(key, 3)
    logits = jax.random.normal(k1, (N, C), dtype=jnp.float32)
    target = jax.random.randint(k2, (N,), 0, C, dtype=jnp.int32)
    loss = incorrect_cross_entropy_loss(logits, target, smoothing)
    jax.block_until_ready(loss)
    ref = _reference(logits, target, smoothing)
    assert jnp.allclose(loss, ref, atol=1e-5, rtol=1e-5), (loss, ref)

    # Case 2: ragged batch (N not divisible by the row tile) and odd C.
    N2, C2 = 50, 40
    k1, k2, key = jax.random.split(key, 3)
    logits2 = jax.random.normal(k1, (N2, C2), dtype=jnp.float32)
    target2 = jax.random.randint(k2, (N2,), 0, C2, dtype=jnp.int32)
    loss2 = incorrect_cross_entropy_loss(logits2, target2, smoothing)
    jax.block_until_ready(loss2)
    ref2 = _reference(logits2, target2, smoothing)
    assert jnp.allclose(loss2, ref2, atol=1e-5, rtol=1e-5), (loss2, ref2)

    # Case 3: bf16 logits (halved HBM traffic path); kernel upcasts internally.
    logits_bf16 = logits.astype(jnp.bfloat16)
    loss3 = incorrect_cross_entropy_loss(logits_bf16, target, smoothing)
    jax.block_until_ready(loss3)
    ref3 = _reference(logits_bf16, target, smoothing)
    assert jnp.allclose(loss3, ref3, atol=1e-4, rtol=1e-4), (loss3, ref3)

    # Case 4: no smoothing (exercises the trace-time specialized path).
    loss4 = incorrect_cross_entropy_loss(logits, target, 0.0)
    jax.block_until_ready(loss4)
    ref4 = _reference(logits, target, 0.0)
    assert jnp.allclose(loss4, ref4, atol=1e-5, rtol=1e-5), (loss4, ref4)

    print("KERNEL_OK")
</pallas_src>

<mosaic_0001>
module attributes {stable_mosaic.version = 11 : i64} {
  func.func @_ice_loss_kernel(%arg0: i32, %arg1: i32, %arg2: memref<32x1xi32, #tpu.memory_space<vmem>>, %arg3: memref<32x32xf32, #tpu.memory_space<vmem>>, %arg4: memref<1x8x128xf32, #tpu.memory_space<vmem>>, %arg5: memref<32x1xf32, #tpu.memory_space<vmem>>) attributes {dimension_semantics = [#tpu.dimension_semantics<parallel>, #tpu.dimension_semantics<arbitrary>], iteration_bounds = array<i64: 2, 1>, scalar_prefetch = 0 : i64, scratch_operands = 1 : i64, tpu.core_type = #tpu.core_type<tc>, window_params = [{transform_indices = @transform_0, window_bounds = array<i64: 32, 1>}, {transform_indices = @transform_1, window_bounds = array<i64: 32, 32>}, {transform_indices = @transform_2, window_bounds = array<i64: 1, 8, 128>}]} {
    %c0_i32 = arith.constant 0 : i32
    %0 = arith.cmpi eq, %arg1, %c0_i32 : i32
    %1 = arith.extui %0 : i1 to i32
    %c0_i32_0 = arith.constant 0 : i32
    %2 = arith.cmpi ne, %1, %c0_i32_0 : i32
    scf.if %2 {
      %cst_20 = arith.constant 0.000000e+00 : f32
      %55 = vector.broadcast %cst_20 : f32 to vector<32x1xf32>
      %c0_21 = arith.constant 0 : index
      %c0_22 = arith.constant 0 : index
      %56 = vector.load %arg5[%c0_21, %c0_22] : memref<32x1xf32, #tpu.memory_space<vmem>>, vector<32x1xf32>
      tpu.vector_store %arg5[%c0_21, %c0_22], %55 {strides = array<i32>} : memref<32x1xf32, #tpu.memory_space<vmem>>, vector<32x1xf32>,
    } else {
    }
    %c0 = arith.constant 0 : index
    %c0_1 = arith.constant 0 : index
    %3 = vector.load %arg3[%c0, %c0_1] : memref<32x32xf32, #tpu.memory_space<vmem>>, vector<32x32xf32>
    %c0_2 = arith.constant 0 : index
    %c0_3 = arith.constant 0 : index
    %4 = vector.load %arg2[%c0_2, %c0_3] : memref<32x1xi32, #tpu.memory_space<vmem>>, vector<32x1xi32>
    %5 = tpu.iota {dimensions = array<i32: 1>} : vector<32x32xi32>
    %cst = arith.constant dense<0xFF800000> : vector<32xf32>
    %6 = vector.multi_reduction <maximumf>, %3, %cst [1] : vector<32x32xf32> to vector<32xf32>
    %7 = vector.shape_cast %6 : vector<32xf32> to vector<32x1xf32>
    %8 = vector.broadcast %7 : vector<32x1xf32> to vector<32x32xf32>
    %9 = arith.cmpf oeq, %3, %8 : vector<32x32xf32>
    %c32_i32 = arith.constant 32 : i32
    %10 = vector.broadcast %c32_i32 : i32 to vector<32x32xi32>
    %11 = arith.select %9, %5, %10 : vector<32x32xi1>, vector<32x32xi32>
    %cst_4 = arith.constant dense<2147483647> : vector<32xi32>
    %12 = vector.multi_reduction <minsi>, %11, %cst_4 [1] : vector<32x32xi32> to vector<32xi32>
    %13 = vector.shape_cast %12 : vector<32xi32> to vector<32x1xi32>
    %14 = arith.cmpi ne, %13, %4 : vector<32x1xi32>
    %15 = vector.broadcast %7 : vector<32x1xf32> to vector<32x32xf32>
    %16 = arith.subf %3, %15 : vector<32x32xf32>
    %17 = math.exp %16 : vector<32x32xf32>
    %cst_5 = arith.constant dense<0.000000e+00> : vector<32xf32>
    %18 = vector.multi_reduction <add>, %17, %cst_5 [1] : vector<32x32xf32> to vector<32xf32>
    %19 = vector.shape_cast %18 : vector<32xf32> to vector<32x1xf32>
    %20 = math.log %19 : vector<32x1xf32>
    %21 = vector.broadcast %4 : vector<32x1xi32> to vector<32x32xi32>
    %22 = arith.cmpi eq, %5, %21 : vector<32x32xi32>
    %cst_6 = arith.constant 0.000000e+00 : f32
    %23 = vector.broadcast %cst_6 : f32 to vector<32x32xf32>
    %24 = arith.select %22, %16, %23 : vector<32x32xi1>, vector<32x32xf32>
    %cst_7 = arith.constant dense<0.000000e+00> : vector<32xf32>
    %25 = vector.multi_reduction <add>, %24, %cst_7 [1] : vector<32x32xf32> to vector<32xf32>
    %26 = vector.shape_cast %25 : vector<32xf32> to vector<32x1xf32>
    %27 = arith.subf %26, %20 : vector<32x1xf32>
    %cst_8 = arith.constant -0.896774172 : f32
    %28 = vector.broadcast %cst_8 : f32 to vector<32x1xf32>
    %29 = arith.mulf %28, %27 : vector<32x1xf32>
    %cst_9 = arith.constant dense<0.000000e+00> : vector<32xf32>
    %30 = vector.multi_reduction <add>, %16, %cst_9 [1] : vector<32x32xf32> to vector<32xf32>
    %31 = vector.shape_cast %30 : vector<32xf32> to vector<32x1xf32>
    %cst_10 = arith.constant 3.200000e+01 : f32
    %32 = vector.broadcast %cst_10 : f32 to vector<32x1xf32>
    %33 = arith.mulf %32, %20 : vector<32x1xf32>
    %34 = arith.subf %31, %33 : vector<32x1xf32>
    %cst_11 = arith.constant 0.0032258064 : f32
    %35 = vector.broadcast %cst_11 : f32 to vector<32x1xf32>
    %36 = arith.mulf %35, %34 : vector<32x1xf32>
    %37 = arith.subf %29, %36 : vector<32x1xf32>
    %c1_i32 = arith.constant 1 : i32
    %38 = arith.muli %arg0, %c1_i32 : i32
    %39 = arith.addi %38, %arg1 : i32
    %c32_i32_12 = arith.constant 32 : i32
    %40 = arith.muli %39, %c32_i32_12 : i32
    %41 = tpu.iota {dimensions = array<i32: 0>} : vector<32x1xi32>
    %42 = vector.broadcast %40 : i32 to vector<32x1xi32>
    %43 = arith.addi %42, %41 : vector<32x1xi32>
    %c64_i32 = arith.constant 64 : i32
    %44 = vector.broadcast %c64_i32 : i32 to vector<32x1xi32>
    %45 = arith.cmpi slt, %43, %44 : vector<32x1xi32>
    %46 = arith.andi %14, %45 : vector<32x1xi1>
    %c0_13 = arith.constant 0 : index
    %c0_14 = arith.constant 0 : index
    %47 = vector.load %arg5[%c0_13, %c0_14] : memref<32x1xf32, #tpu.memory_space<vmem>>, vector<32x1xf32>
    %cst_15 = arith.constant 0.000000e+00 : f32
    %48 = vector.broadcast %cst_15 : f32 to vector<32x1xf32>
    %49 = arith.select %46, %37, %48 : vector<32x1xi1>, vector<32x1xf32>
    %50 = arith.addf %47, %49 : vector<32x1xf32>
    %c0_16 = arith.constant 0 : index
    %c0_17 = arith.constant 0 : index
    %51 = vector.load %arg5[%c0_16, %c0_17] : memref<32x1xf32, #tpu.memory_space<vmem>>, vector<32x1xf32>
    tpu.vector_store %arg5[%c0_16, %c0_17], %50 {strides = array<i32>} : memref<32x1xf32, #tpu.memory_space<vmem>>, vector<32x1xf32>,
    %c0_i32_18 = arith.constant 0 : i32
    %52 = arith.cmpi eq, %arg1, %c0_i32_18 : i32
    %53 = arith.extui %52 : i1 to i32
    %c0_i32_19 = arith.constant 0 : i32
    %54 = arith.cmpi ne, %53, %c0_i32_19 : i32
    scf.if %54 {
      %c0_20 = arith.constant 0 : index
      %c0_21 = arith.constant 0 : index
      %55 = vector.load %arg5[%c0_20, %c0_21] : memref<32x1xf32, #tpu.memory_space<vmem>>, vector<32x1xf32>
      %56 = vector.shape_cast %55 : vector<32x1xf32> to vector<1x32x1xf32>
      %cst_22 = arith.constant dense<0.000000e+00> : vector<1xf32>
      %57 = vector.multi_reduction <add>, %56, %cst_22 [1, 2] : vector<1x32x1xf32> to vector<1xf32>
      %58 = vector.shape_cast %57 : vector<1xf32> to vector<1x1x1xf32>
      %59 = vector.extract %58[0, 0, 0] : f32 from vector<1x1x1xf32>
      %60 = vector.broadcast %59 : f32 to vector<1x8x128xf32>
      %c0_23 = arith.constant 0 : index
      %c0_24 = arith.constant 0 : index
      %c0_25 = arith.constant 0 : index
      %61 = vector.load %arg4[%c0_23, %c0_24, %c0_25] : memref<1x8x128xf32, #tpu.memory_space<vmem>>, vector<1x8x128xf32>
      tpu.vector_store %arg4[%c0_23, %c0_24, %c0_25], %60 {strides = array<i32>} : memref<1x8x128xf32, #tpu.memory_space<vmem>>, vector<1x8x128xf32>,
    } else {
    }
    return
  }
  func.func @transform_0(%arg0: i32, %arg1: i32) -> (i32, i32) {
    %c1_i32 = arith.constant 1 : i32
    %0 = arith.muli %arg0, %c1_i32 : i32
    %1 = arith.addi %0, %arg1 : i32
    %c1_i32_0 = arith.constant 1 : i32
    %2 = arith.minsi %1, %c1_i32_0 : i32
    %c0_i32 = arith.constant 0 : i32
    %c0_i32_1 = arith.constant 0 : i32
    return %2, %c0_i32 : i32, i32
  }
  func.func @transform_1(%arg0: i32, %arg1: i32) -> (i32, i32) {
    %c1_i32 = arith.constant 1 : i32
    %0 = arith.muli %arg0, %c1_i32 : i32
    %1 = arith.addi %0, %arg1 : i32
    %c1_i32_0 = arith.constant 1 : i32
    %2 = arith.minsi %1, %c1_i32_0 : i32
    %c0_i32 = arith.constant 0 : i32
    %c0_i32_1 = arith.constant 0 : i32
    return %2, %c0_i32 : i32, i32
  }
  func.func @transform_2(%arg0: i32, %arg1: i32) -> (i32, i32, i32) {
    %c0_i32 = arith.constant 0 : i32
    %c0_i32_0 = arith.constant 0 : i32
    %c0_i32_1 = arith.constant 0 : i32
    return %arg0, %c0_i32, %c0_i32_0 : i32, i32, i32
  }
}

</mosaic_0001>

<bundles_post_ra>
// kernel: tpu_custom_call.1
= control target key start
LH: loop header
LB: loop body
LE: loop exit
PB: predicated region body
PF: predicated region fallthrough
CT: control target
= control target key end

     0   :  { %7 = vsyncpa [#allocation4], 0  ;;  %s1021_s0 = inlined_call_operand.vmem [shape: s32[64,1], index: 0, kind: input, shape index: {}]   ;;  %s1022_s1 = inlined_call_operand.vmem [shape: f32[64,32], index: 1, kind: input, shape index: {}]   ;;  %s1023_s2 = inlined_call_operand.hbm [shape: f32[2,8,128], index: 2, kind: output, shape index: {}]  }
   0x1   :  { %9 = vsyncpa [#allocation4 + $0x1], 0  ;;  %s767_s9 = smov 0   ;;  %s769_s10 = smov 0  }
   0x2   :  { %s771_s11 = smov 0   ;;  %s773_s12 = smov 0  }
   0x3   :  { %s775_s13 = smov 0   ;;  %s777_s14 = smov 0  }
   0x4 LB: > { %s579_s15 = sadd.s32 4294967295, %s747_s14   ;;  %s580_s16 = sadd.s32 4294967294, %s747_s14   ;;  %s747_s14 = sphi %s777_s14, %s15_s14   ;;  %s743_s13 = sphi %s775_s13, %s1030_s13   ;;  %s739_s12 = sphi %s773_s12, %s1029_s12   ;;  %s735_s11 = sphi %s771_s11, %s1028_s11   ;;  %s731_s10 = sphi %s769_s10, %s1027_s10   ;;  %s727_s9 = sphi %s767_s9, %s1026_s9  }
   0x5   : > { %s27_s17 = sadd.s32 1, %s743_s13  ;;  %s98_s18 = sadd.s32 1, %s735_s11 }
   0x6   : > { %p29_p0 = scmp.ge.s32.totalorder %s27_s17, 2  ;;  %p108_p1 = scmp.ne.s32.totalorder %s735_s11, %s731_s10 }
   0x7   : > { %p109_p2 = scmp.eq.s32.totalorder %s579_s15, 1  ;;  %p114_p3 = scmp.ne.s32.totalorder %s731_s10, %s727_s9 }
   0x8   : > { %s1032_s17 = smov (%p29_p0, %s27_s17), 0  ;;  %p115_p5 = scmp.eq.s32.totalorder %s580_s16, 1 }
   0x9   : > { %p807_p4 = por %p109_p2, %p108_p1  ;;  %s95_s20 = ssub.s32 %s743_s13, %s1032_s17 }
   0xa   : > { %p583_p6 = scmp.ge.s32.totalorder %s747_s14, 1  ;;  %p96_p7 = scmp.eq.s32.totalorder %s95_s20, 0 }
   0xb   : > { %p814_p8 = por %p115_p5, %p114_p3  ;;  %p163_p9 = scmp.lt.s32.totalorder %s747_s14, 3 }
   0xc   : > { %s820_s22 = scalar_select %p96_p7, %s735_s11, %s98_s18  }
   0xd   : > { %p164_p10 = pnand %p583_p6, %p163_p9 }
   0xe   : > { %p197_p11 = scmp.lt.s32.totalorder (!%p164_p10), %s739_s12, 1  ;;  %s589_s4 = sshll.u32 (!%p164_p10), %s739_s12, 5 }
   0xf   : > { %167 = sbr.rel (%p164_p10) target bundleno = 753 (0x2f1), region = 28  ;;  %s193_s5 = sand.u32 (!%p164_p10), 1, %s731_s10  }
  0x10   : > { %s584_s6 = sshll.u32 (!%p164_p10), %s193_s5, 3  ;;  %s591_s15 = sshll.u32 (!%p164_p10), %s739_s12, 7 }
  0x11   : > { %s195_s7 = scalar_lea.vmem (!%p164_p10), [#allocation3], %s584_s6  ;;  %s751_s26 = smov (!%p164_p10), [#allocation3]  }
  0x12   : > { %s500_s8 = sshll.u32 (!%p164_p10), %s195_s7, 4  ;;  %s978_s8 = int_to_ptr.vmem [resolvable:$true] %s500_s8 }
  0x14   : > { %s198_s23 = scalar_select %p197_p11, %s739_s12, 1  ;;  %vm239_vm0 = vcmask 261120   ;;  %v749_v8 = vmov 0   ;;  %v237_v9 = vlaneseq  ;;  %vm224_vm11 = vcmask 7168  }
  0x15   : > { %654 = vset.pattern.permute.xlu1 %v749_v8  ;;  %653 = vset.pattern.permute.xlu0 %v749_v8  ;;  %s675_s12 = sshll.u32 %s751_s26, 4  ;;  %s676_s12 = int_to_ptr.vmem [resolvable:$false] %s675_s12 }
  0x16   : > { %s585_s24 = sshll.u32 %s198_s23, 2  ;;  %v843_v10 = vand.u32 127, %v237_v9  ;;  %s498_s23 = scalar_lea.hbm %s1023_s2, %s591_s15 }
  0x17   : > { %p200_p12 = scmp.lt.s32.totalorder %s585_s24, 7  ;;  %s677_s27 = scalar_lea.vmem %s676_s12, 256 }
  0x18   : > { %p678_p2 = scmp.lt.s32.totalorder %s978_s8, %s676_s12 }
  0x19   : > { %s1034_s24 = smov (!%p200_p12, %s585_s24), 7 }
  0x1a   : > { %s586_s25 = sshll.u32 %s1034_s24, 3  ;;  %s487_s24 = scalar_lea.sflag [#allocation4], %s193_s5 }
  0x1b   : > { %s215_s28 = scalar_lea.vmem %s1022_s1, %s586_s25  ;;  %s203_s3 = scalar_lea.vmem %s1021_s0, %s586_s25 }
  0x1c   : > { %v229_v0 = vld [vmem:[%s215_s28] sm:$0xff]  ;;  %v832_v1 = vld [vmem:[%s215_s28 + $0x10] sm:$0xff]  ;;  %v230_v2 = vld [vmem:[%s215_s28 + $0x8] sm:$0xff]  ;;  %s671_s25 = scalar_lea.vmem %s978_s8, 128 }
  0x1d   : > { %v240_v3 = vsel %vm239_vm0, %v229_v0, -inf  ;;  %v246_v4 = vsel %vm239_vm0, %v832_v1, -inf  ;;  %v837_v5 = vld [vmem:[%s215_s28 + $0x18] sm:$0xff]  ;;  %v243_v6 = vsel %vm239_vm0, %v230_v2, -inf  ;;  %v875_v26 = vld [vmem:[%s203_s3 + $0x8] sm:$0xff]  ;;  %v878_v27 = vld [vmem:[%s203_s3 + $0x10] sm:$0xff]  ;;  %p672_p13 = scmp.ne.s32.totalorder %s978_s8, %s671_s25  ;;  %p679_p3 = scmp.lt.s32.totalorder %s677_s27, %s671_s25 }
  0x1e   : > { %241 = vmax.xlane.f32.xlu0 %v240_v3  ;;  %247 = vmax.xlane.f32.xlu1 %v246_v4  ;;  %v249_v7 = vsel %vm239_vm0, %v837_v5, -inf  ;;  %v880_v28 = vld [vmem:[%s203_s3] sm:$0xff]  ;;  %v894_v38 = vld [vmem:[%s203_s3 + $0x18] sm:$0xff] }
  0x1f   : > { %p673_p0 = pnand %p672_p13, %p807_p4  ;;  %p680_p5 = por %p679_p3, %p678_p2 }
  0x21   : > { %p674_p1 = pneg %p673_p0 }
  0x22   : > { %244 = vmax.xlane.f32.xlu0 %v243_v6  ;;  %250 = vmax.xlane.f32.xlu1 %v249_v7 }
  0x23   : > { %p681_p6 = pnand %p680_p5, %p674_p1 }
  0xa7   : > { %v242_v11 = vpop.xlane.xlu0 %241  ;;  %v248_v12 = vpop.xlane.xlu1 %247 }
  0xa8   : > { %vm252_vm1 = vcmp.eq.f32.partialorder %v229_v0, %v242_v11  ;;  %vm254_vm2 = vcmp.eq.f32.partialorder %v832_v1, %v248_v12  ;;  %v324_v39 = vsub.f32 %v229_v0, %v242_v11  ;;  %v326_v43 = vsub.f32 %v832_v1, %v248_v12 }
  0xa9   : > { %v256_v13 = vsel %vm252_vm1, %v843_v10, 32  ;;  %v258_v14 = vsel %vm254_vm2, %v843_v10, 32 }
  0xaa   : > { %v849_v15 = vsel %vm239_vm0, %v256_v13, 2147483647  ;;  %v853_v18 = vsel %vm239_vm0, %v258_v14, 2147483647  ;;  %v328_v40 = vmul.f32 1.442695, %v324_v39 }
  0xab   : > { %v245_v16 = vpop.xlane.xlu0 %244  ;;  %v262_v17 = vshra.s32 %v849_v15, 16  ;;  %v292_v19 = vshra.s32 %v853_v18, 16  ;;  %v251_v31 = vpop.xlane.xlu1 %250  ;;  %v332_v44 = vmul.f32 1.442695, %v326_v43  ;;  %v396_v60 = vsel %vm239_vm0, %v324_v39, 0.0 }
  0xac   : > { %vm253_vm3 = vcmp.eq.f32.partialorder %v230_v2, %v245_v16  ;;  %v325_v29 = vsub.f32 %v230_v2, %v245_v16  ;;  %vm255_vm4 = vcmp.eq.f32.partialorder %v837_v5, %v251_v31  ;;  %v900_v45 = vsub.f32 %v837_v5, %v251_v31 }
  0xad   : > { %v257_v20 = vsel %vm253_vm3, %v843_v10, 32  ;;  %v857_v21 = vcvt.s32.f32 %v262_v17  ;;  %v863_v23 = vcvt.s32.f32 %v292_v19  ;;  %v259_v32 = vsel %vm255_vm4, %v843_v10, 32 }
  0xae   : > { %v860_v22 = vsel %vm239_vm0, %v257_v20, 2147483647  ;;  %v330_v30 = vmul.f32 1.442695, %v325_v29  ;;  %v887_v33 = vsel %vm239_vm0, %v259_v32, 2147483647 }
  0xaf   : > { %265 = vmin.xlane.f32.xlu0 %v857_v21  ;;  %v277_v24 = vshra.s32 %v860_v22, 16  ;;  %v307_v35 = vshra.s32 %v887_v33, 16  ;;  %v334_v47 = vmul.f32 1.442695, %v900_v45  ;;  %v399_v55 = vsel %vm239_vm0, %v325_v29, 0.0 }
  0xb0   : > { %655 = vpow2.f32 %v330_v30  ;;  %v291_v62 = vand.u32 65535, %v853_v18  ;;  %v402_v0 = vsel %vm239_vm0, %v326_v43, 0.0  ;;  %v261_v3 = vand.u32 65535, %v849_v15 }
  0xb1   : > { %v866_v25 = vcvt.s32.f32 %v277_v24  ;;  %v891_v37 = vcvt.s32.f32 %v307_v35  ;;  %657 = vpow2.f32 %v328_v40  ;;  %v276_v7 = vand.u32 65535, %v860_v22 }
  0xb2   : > { %659 = vpow2.f32 %v332_v44  ;;  %v293_v2 = vcvt.s32.f32 %v291_v62  ;;  %v263_v6 = vcvt.s32.f32 %v261_v3  ;;  %v750_v13 = vmov 0.0  }
  0xb3   : > { %295 = vmin.xlane.f32.xlu0 %v863_v23  ;;  %280 = vmin.xlane.f32.xlu1 %v866_v25  ;;  %661 = vpow2.f32 %v334_v47  ;;  %v278_v11 = vcvt.s32.f32 %v276_v7  ;;  %227 = vst.msk [vmem:[#allocation2 + $0x10] sm:$0xff] %vm224_vm11, %v750_v13  ;;  %225 = vst.msk [vmem:[#allocation2] sm:$0xff] %vm224_vm11, %v750_v13  ;;  %v306_v14 = vand.u32 65535, %v887_v33  ;;  %v405_v19 = vsel %vm239_vm0, %v900_v45, 0.0 }
  0xb4   : > { %226 = vst.msk [vmem:[#allocation2 + $0x8] sm:$0xff] %vm224_vm11, %v750_v13  ;;  %228 = vst.msk [vmem:[#allocation2 + $0x18] sm:$0xff] %vm224_vm11, %v750_v13  ;;  %v951_v47 = vstv %s589_s4 }
  0xb5   : > { %v308_v16 = vcvt.s32.f32 %v306_v14 }
  0xba   : > { %v444_v7 = vld [vmem:[#allocation2] sm:$0xff] }
  0xbd   : > { %v656_v34 = vpop.eup %655 }
  0xbe   : > { %v339_v36 = vsel %vm239_vm0, %v656_v34, 0.0  ;;  %v658_v41 = vpop.eup %657 }
  0xbf   : > { %v336_v42 = vsel %vm239_vm0, %v658_v41, 0.0  ;;  %v660_v57 = vpop.eup %659 }
  0xc0   : > { %v342_v59 = vsel %vm239_vm0, %v660_v57, 0.0  ;;  %v662_v61 = vpop.eup %661 }
  0xc1   : > { %v345_v63 = vsel %vm239_vm0, %v662_v61, 0.0 }
  0xc4   : > { %360 = vperm.xlu1 %654, %v875_v26  }
  0xc8   : > { %363 = vperm.xlu1 %654, %v878_v27  }
  0xc9   : > { %357 = vperm.xlu0 %653, %v880_v28  }
  0xe8   : > { %340 = vadd.xlane.f32.xlu0 %v339_v36 }
  0xec   : > { %310 = vmin.xlane.f32.xlu1 %v891_v37 }
  0xfd   : > { %366 = vperm.xlu1 %654, %v894_v38  }
 0x121   : > { %337 = vadd.xlane.f32.xlu1 %v336_v42 }
 0x138   : > { %v902_v46 = vpop.xlane.xlu0 %265 }
 0x139   : > { %vm267_vm9 = vcmp.eq.f32.partialorder %v857_v21, %v902_v46  ;;  %v272_v42 = vcvt.f32.s32 %v902_v46 }
 0x13a   : > { %v268_v8 = vsel %vm267_vm9, %v263_v6, inf }
 0x13c   : > { %v905_v48 = vpop.xlane.xlu1 %280  ;;  %v907_v49 = vpop.xlane.xlu0 %295 }
 0x13d   : > { %vm297_vm8 = vcmp.eq.f32.partialorder %v863_v23, %v907_v49  ;;  %vm282_vm10 = vcmp.eq.f32.partialorder %v866_v25, %v905_v48  ;;  %v302_v44 = vcvt.f32.s32 %v907_v49 }
 0x13e   : > { %v298_v5 = vsel %vm297_vm8, %v293_v2, inf  ;;  %v283_v12 = vsel %vm282_vm10, %v278_v11, inf }
 0x13f   : > { %v303_v49 = vshll.u32 %v302_v44, 16 }
 0x140   : > { %v361_v50 = vpop.permute.xlu1 %360 }
 0x141   : > { %vm369_vm5 = vcmp.eq.s32.totalorder %v843_v10, %v361_v50 }
 0x142   : > { %v373_v51 = vsel %vm369_vm5, %v325_v29, 0.0 }
 0x143   : > { %v379_v52 = vsel %vm239_vm0, %v373_v51, 0.0 }
 0x144   : > { %380 = vadd.xlane.f32.xlu1 %v379_v52  ;;  %v358_v53 = vpop.permute.xlu0 %357  ;;  %v364_v58 = vpop.permute.xlu1 %363 }
 0x145   : > { %vm368_vm6 = vcmp.eq.s32.totalorder %v843_v10, %v358_v53  ;;  %vm370_vm7 = vcmp.eq.s32.totalorder %v843_v10, %v364_v58  ;;  %v287_v58 = vcvt.f32.s32 %v905_v48 }
 0x146   : > { %v372_v54 = vsel %vm368_vm6, %v324_v39, 0.0  ;;  %v374_v1 = vsel %vm370_vm7, %v326_v43, 0.0 }
 0x147   : > { %v376_v56 = vsel %vm239_vm0, %v372_v54, 0.0  ;;  %v382_v4 = vsel %vm239_vm0, %v374_v1, 0.0 }
 0x148   : > { %400 = vadd.xlane.f32.xlu1 %v399_v55  ;;  %377 = vadd.xlane.f32.xlu0 %v376_v56  ;;  %v273_v56 = vshll.u32 %v272_v42, 16 }
 0x14c   : > { %343 = vadd.xlane.f32.xlu1 %v342_v59  ;;  %397 = vadd.xlane.f32.xlu0 %v396_v60 }
 0x150   : > { %346 = vadd.xlane.f32.xlu1 %v345_v63  ;;  %403 = vadd.xlane.f32.xlu0 %v402_v0 }
 0x154   : > { %383 = vadd.xlane.f32.xlu1 %v382_v4  ;;  %299 = vmin.xlane.f32.xlu0 %v298_v5 }
 0x158   : > { %269 = vmin.xlane.f32.xlu1 %v268_v8  ;;  %v288_v8 = vshll.u32 %v287_v58, 16 }
 0x15c   : > { %284 = vmin.xlane.f32.xlu1 %v283_v12 }
 0x171   : > { %v341_v23 = vpop.xlane.xlu0 %340 }
 0x175   : > { %v934_v15 = vpop.xlane.xlu1 %310 }
 0x176   : > { %vm312_vm12 = vcmp.eq.f32.partialorder %v891_v37, %v934_v15  ;;  %v947_v37 = vshrl.u32 %v237_v9, 7 }
 0x177   : > { %v313_v17 = vsel %vm312_vm12, %v308_v16, inf }
 0x178   : > { %314 = vmin.xlane.f32.xlu1 %v313_v17  ;;  %v429_v50 = vadd.s32 16, %v947_v37  ;;  %v432_v51 = vadd.s32 %v951_v47, %v947_v37  ;;  %v428_v55 = vadd.s32 8, %v947_v37 }
 0x179   : > { %v367_v18 = vpop.permute.xlu1 %366 }
 0x17a   : > { %vm371_vm13 = vcmp.eq.s32.totalorder %v843_v10, %v367_v18  ;;  %v434_v62 = vadd.s32 %v951_v47, %v429_v50  ;;  %vm436_vm14 = vcmp.lt.s32.totalorder %v432_v51, 64  ;;  %v433_v3 = vadd.s32 %v951_v47, %v428_v55 }
 0x17b   : > { %v375_v20 = vsel %vm371_vm13, %v900_v45, 0.0 }
 0x17c   : > { %406 = vadd.xlane.f32.xlu1 %v405_v19  ;;  %v385_v21 = vsel %vm239_vm0, %v375_v20, 0.0  ;;  %vm437_vm1 = vcmp.lt.s32.totalorder %v433_v3, 64  ;;  %vm438_vm2 = vcmp.lt.s32.totalorder %v434_v62, 64 }
 0x17d   : > { %386 = vadd.xlane.f32.xlu0 %v385_v21  ;;  %v445_v21 = vld [vmem:[#allocation2 + $0x8] sm:$0xff] }
 0x1aa   : > { %v338_v22 = vpop.xlane.xlu1 %337 }
 0x1ab   : > { %663 = vlog2.f32 %v338_v22  ;;  %v446_v22 = vld [vmem:[#allocation2 + $0x10] sm:$0xff] }
 0x1ac   : > { %665 = vlog2.f32 %v341_v23 }
 0x1b8   : > { %v664_v30 = vpop.eup %663 }
 0x1b9   : > { %v349_v32 = vmul.f32 0.6931472, %v664_v30  ;;  %v666_v35 = vpop.eup %665  ;;  %v317_v30 = vcvt.f32.s32 %v934_v15  ;;  %v447_v15 = vld [vmem:[#allocation2 + $0x18] sm:$0xff] }
 0x1ba   : > { %v351_v39 = vmul.f32 0.6931472, %v666_v35 }
 0x1bb   : > { %v408_v36 = vmul.f32 32.0, %v349_v32 }
 0x1bc   : > { %v409_v52 = vmul.f32 32.0, %v351_v39 }
 0x1cd   : > { %v381_v24 = vpop.xlane.xlu1 %380 }
 0x1ce   : > { %v389_v0 = vsub.f32 %v381_v24, %v351_v39 }
 0x1d0   : > { %v393_v14 = vmul.f32 -0.8967742, %v389_v0 }
 0x1d1   : > { %v401_v25 = vpop.xlane.xlu1 %400  ;;  %v378_v29 = vpop.xlane.xlu0 %377 }
 0x1d2   : > { %v388_v45 = vsub.f32 %v378_v29, %v349_v32  ;;  %v413_v59 = vsub.f32 %v401_v25, %v409_v52 }
 0x1d4   : > { %v392_v60 = vmul.f32 -0.8967742, %v388_v45  ;;  %v417_v11 = vmul.f32 0.0032258064, %v413_v59 }
 0x1d5   : > { %v344_v31 = vpop.xlane.xlu1 %343  ;;  %v398_v10 = vpop.xlane.xlu0 %397 }
 0x1d6   : > { %667 = vlog2.f32 %v344_v31  ;;  %v412_v40 = vsub.f32 %v398_v10, %v408_v36  ;;  %v421_v20 = vsub.f32 %v393_v14, %v417_v11 }
 0x1d8   : > { %v416_v53 = vmul.f32 0.0032258064, %v412_v40 }
 0x1d9   : > { %v943_v33 = vpop.xlane.xlu1 %346  ;;  %v404_v34 = vpop.xlane.xlu0 %403 }
 0x1da   : > { %v420_v1 = vsub.f32 %v392_v60, %v416_v53  ;;  %669 = vlog2.f32 %v943_v33 }
 0x1dd   : > { %v384_v41 = vpop.xlane.xlu1 %383  ;;  %v300_v43 = vpop.xlane.xlu0 %299 }
 0x1de   : > { %v301_v9 = vcvt.f32.s32 %v300_v43 }
 0x1e0   : > { %v304_v2 = vadd.s32 %v303_v49, %v301_v9 }
 0x1e1   : > { %v270_v54 = vpop.xlane.xlu1 %269 }
 0x1e2   : > { %v271_v57 = vcvt.f32.s32 %v270_v54  ;;  %vm322_vm3 = vcmp.ne.s32.totalorder %v304_v2, %v878_v27 }
 0x1e3   : > { %v668_v46 = vpop.eup %667  ;;  %vm442_vm6 = vmand %vm322_vm3, %vm438_vm2 }
 0x1e4   : > { %v353_v61 = vmul.f32 0.6931472, %v668_v46  ;;  %v274_v63 = vadd.s32 %v273_v56, %v271_v57 }
 0x1e5   : > { %v285_v4 = vpop.xlane.xlu1 %284 }
 0x1e6   : > { %v410_v5 = vmul.f32 32.0, %v353_v61  ;;  %v390_v6 = vsub.f32 %v384_v41, %v353_v61  ;;  %vm320_vm15 = vcmp.ne.s32.totalorder %v274_v63, %v880_v28  ;;  %v286_v48 = vcvt.f32.s32 %v285_v4 }
 0x1e7   : > { %vm440_vm0 = vmand %vm320_vm15, %vm436_vm14  ;;  %v670_v27 = vpop.eup %669 }
 0x1e8   : > { %v414_v12 = vsub.f32 %v404_v34, %v410_v5  ;;  %v448_v13 = vsel %vm440_vm0, %v420_v1, 0.0  ;;  %v289_v17 = vadd.s32 %v288_v8, %v286_v48  ;;  %v394_v19 = vmul.f32 -0.8967742, %v390_v6 }
 0x1e9   : > { %v452_v16 = vadd.f32 %v448_v13, %v444_v7  ;;  %v355_v31 = vmul.f32 0.6931472, %v670_v27  ;;  %v318_v34 = vshll.u32 %v317_v30, 16 }
 0x1ea   : > { %v418_v18 = vmul.f32 0.0032258064, %v414_v12  ;;  %vm321_vm4 = vcmp.ne.s32.totalorder %v289_v17, %v875_v26  ;;  %v430_v26 = vadd.s32 24, %v947_v37 }
 0x1eb   : > { %457 = vst.msk [vmem:[#allocation2] sm:$0xff] %vm224_vm11, %v452_v16  ;;  %vm441_vm5 = vmand %vm321_vm4, %vm437_vm1  ;;  %v411_v35 = vmul.f32 32.0, %v355_v31 }
 0x1ec   : > { %v422_v28 = vsub.f32 %v394_v19, %v418_v18  ;;  %v449_v23 = vsel %vm441_vm5, %v421_v20, 0.0  ;;  %v435_v36 = vadd.s32 %v951_v47, %v430_v26 }
 0x1ed   : > { %v453_v25 = vadd.f32 %v449_v23, %v445_v21 }
 0x1ee   : > { %v450_v24 = vsel %vm442_vm6, %v422_v28, 0.0  ;;  %vm439_vm7 = vcmp.lt.s32.totalorder %v435_v36, 64 }
 0x1ef   : > { %v454_v29 = vadd.f32 %v450_v24, %v446_v22  ;;  %458 = vst.msk [vmem:[#allocation2 + $0x8] sm:$0xff] %vm224_vm11, %v453_v25 }
 0x1f1   : > { %459 = vst.msk [vmem:[#allocation2 + $0x10] sm:$0xff] %vm224_vm11, %v454_v29 }
 0x1f2   : > { %v464_v52 = vld [vmem:[#allocation2] sm:$0xff] }
 0x1f3   : > { %v468_v9 = vsel %vm224_vm11, %v464_v52, 0.0 }
 0x1f6   : > { %v465_v50 = vld [vmem:[#allocation2 + $0x8] sm:$0xff] }
 0x1f7   : > { %v469_v47 = vsel %vm224_vm11, %v465_v50, 0.0 }
 0x1f8   : > { %v466_v53 = vld [vmem:[#allocation2 + $0x10] sm:$0xff]  ;;  %v470_v54 = vadd.f32 %v469_v47, %v468_v9 }
 0x1f9   : > { %v471_v55 = vsel %vm224_vm11, %v466_v53, 0.0 }
 0x1fa   : > { %v472_v56 = vadd.f32 %v471_v55, %v470_v54 }
 0x201   : > { %v315_v10 = vpop.xlane.xlu1 %314 }
 0x202   : > { %v316_v32 = vcvt.f32.s32 %v315_v10 }
 0x204   : > { %v319_v39 = vadd.s32 %v318_v34, %v316_v32 }
 0x205   : > { %v407_v40 = vpop.xlane.xlu1 %406 }
 0x206   : > { %v415_v41 = vsub.f32 %v407_v40, %v411_v35  ;;  %v387_v33 = vpop.xlane.xlu0 %386  ;;  %vm323_vm8 = vcmp.ne.s32.totalorder %v319_v39, %v894_v38 }
 0x207   : > { %v391_v42 = vsub.f32 %v387_v33, %v355_v31  ;;  %vm443_vm9 = vmand %vm323_vm8, %vm439_vm7 }
 0x208   : > { %v419_v43 = vmul.f32 0.0032258064, %v415_v41 }
 0x209   : > { %v395_v44 = vmul.f32 -0.8967742, %v391_v42 }
 0x20b   : > { %v423_v45 = vsub.f32 %v395_v44, %v419_v43 }
 0x20d   : > { %v451_v37 = vsel %vm443_vm9, %v423_v45, 0.0 }
 0x20e   : > { %v455_v51 = vadd.f32 %v451_v37, %v447_v15 }
 0x210   : > { %460 = vst.msk [vmem:[#allocation2 + $0x18] sm:$0xff] %vm224_vm11, %v455_v51 }
 0x217   : > { %v467_v38 = vld [vmem:[#allocation2 + $0x18] sm:$0xff] }
 0x218   : > { %v473_v57 = vsel %vm224_vm11, %v467_v38, 0.0 }
 0x219   : > { %v474_v46 = vadd.f32 %v473_v57, %v472_v56 }
 0x21b   : > { %475 = vadd.xlane.f32.xlu0 %v474_v46 }
 0x2a4   : > { %v476_v58 = vpop.xlane.xlu0 %475 }
 0x2a5   : > { %v477_v49 = vrot.slane %v476_v58, 4 }
 0x2a7   : > { %v478_v59 = vadd.f32 %v477_v49, %v476_v58 }
 0x2a9   : > { %v479_v60 = vrot.slane %v478_v59, 2 }
 0x2ab   : > { %v480_v61 = vadd.f32 %v479_v60, %v478_v59 }
 0x2ad   : > { %v481_v62 = vrot.slane %v480_v61, 1 }
 0x2af   : > { %v482_v63 = vadd.f32 %v481_v62, %v480_v61 }
 0x2b1   : > { %594 = vpush %v482_v63 }
 0x2e2   : > { %s595_s16 = spop %594 }
 0x2e3   : > { %v484_v0 = vstv %s595_s16 }
 0x2e4   : > { %485 = vst [vmem:[%s195_s7] sm:$0xff] %v484_v0 }
 0x2e5   : > { %684 = shalt.err (!%p681_p6)
}
 0x2e6   : > { %s685_s28 = scalar_lea.hbm %s498_s23, 128  ;;  %s689_s3 = scalar_lea.hbm %s1023_s2, 256 }
 0x2e7   : > { %p686_p7 = scmp.ne.s32.totalorder %s498_s23, %s685_s28  ;;  %p690_p11 = scmp.lt.s32.totalorder %s498_s23, %s1023_s2 }
 0x2e8   : > { %p691_p12 = scmp.lt.s32.totalorder %s689_s3, %s685_s28 }
 0x2e9   : > { %p687_p9 = pnand %p686_p7, %p807_p4 }
 0x2ea   : > { %p692_p13 = por %p691_p12, %p690_p11 }
 0x2eb   : > { %p688_p10 = pneg %p687_p9 }
 0x2ed   : > { %p693_p0 = pnand %p692_p13, %p688_p10 }
 0x2ef   : > { %696 = shalt.err (!%p693_p0)
}
 0x2f0   : > { %596 = dma.vmem_to_hbm [thread:$0]  (%p807_p4), %s978_s8, 128, %s498_s23, %s487_s24  }
 0x2f1 PF: > { %p602_p1 = scmp.ge.s32.totalorder %s747_s14, 2  ;;  %s512_s6 = sand.u32 1, %s727_s9  }
 0x2f2   : > { %s513_s7 = scalar_lea.sflag [#allocation4], %s512_s6 }
 0x2f3   : > { %p599_p2 = pnand %p602_p1, %p814_p8 }
 0x2f5   : > { %p600_p3 = pneg %p599_p2 }
 0x2f7   : > { %722 = dma.done.wait (%p600_p3), %s513_s7, 128  }
 0x2f8   : > { %724 = vsyncadd (%p600_p3), %s513_s7, 4294967168  ;;  %s15_s14 = sadd.s32 1, %s747_s14   ;;  %s1026_s9 = smov %s731_s10 }
 0x2f9   : > { %p12_p5 = scmp.ge.s32.totalorder %s15_s14, 4   ;;  %s1027_s10 = smov %s735_s11 }
 0x2fa   : > { %s1028_s11 = smov %s820_s22  ;;  %s1029_s12 = smov %s743_s13 }
 0x2fb   : > { %s1030_s13 = smov %s1032_s17  ;;  %14 = sbr.rel (!%p12_p5) target bundleno = 4 (0x4), region = 74 }
 0x300   :  { %518 = vsyncpa [#allocation4], 1 }
 0x301   :  { %520 = vsyncpa [#allocation4 + $0x1], 1 }

</bundles_post_ra>
